<compile_context>
chip_gen: v7x
topology: tpu7x:2x2x1
jax: 0.10.0
libtpu: 0.0.40
codegen_flags: <defaults>
</compile_context>

<pallas_src>
import jax
import jax.numpy as jnp
from jax.experimental import pallas as pl
from jax.experimental.pallas import tpu as pltpu


def _make_kernel(n_inputs):
    def kernel(*refs):
        # refs: x_0..x_{n-1}, wf_0..wf_{n-1}, bf, ws, we, out
        x_refs = refs[:n_inputs]
        w_refs = refs[n_inputs:2 * n_inputs]
        bf_ref, ws_ref, we_ref, out_ref = refs[2 * n_inputs:]

        # fusion: h = sum_i x_i @ Wf_i + b   (K-split of the concat; f32 acc)
        h = jnp.dot(x_refs[0][...], w_refs[0][...],
                    preferred_element_type=jnp.float32)
        for xr, wr in zip(x_refs[1:], w_refs[1:]):
            h = h + jnp.dot(xr[...], wr[...],
                            preferred_element_type=jnp.float32)
        h = h + bf_ref[...].astype(jnp.float32)

        # SENet gates = sigmoid(relu(h @ Ws) @ We)   (per-row, epilogue in f32)
        g = jnp.dot(h.astype(ws_ref.dtype), ws_ref[...],
                    preferred_element_type=jnp.float32)
        g = jnp.maximum(g, 0.0)
        g = jnp.dot(g.astype(we_ref.dtype), we_ref[...],
                    preferred_element_type=jnp.float32)
        g = jax.nn.sigmoid(g)

        out_ref[...] = (h * g).astype(out_ref.dtype)

    return kernel


def _round_up(x, m):
    return ((x + m - 1) // m) * m


def _pick_batch_tile(B, K_total, H_pad, itemsize, budget_bytes=8 << 20):
    """Largest multiple-of-8 batch tile whose double-buffered activation
    blocks fit in `budget_bytes` (safe under v5e's 16 MiB scoped VMEM
    default, hence also fine on v6e / v7x)."""
    per_row = 2 * (K_total + H_pad) * max(int(itemsize), 4)  # 2x = dbl buffer
    tb = budget_bytes // max(per_row, 1)
    tb = max(8, min(1024, (tb // 8) * 8))
    if tb >= B:
        return B  # single full-batch tile (block dim == full array dim)
    return tb


def concat_dense_se(inputs, wf, bf, ws, we):
    """Fused ConcatDenseSE forward (eval mode).

    inputs: list of [B, D_i] arrays.
    wf: [sum(D_i), H]  fusion.weight^T        bf: [H]  fusion.bias
    ws: [H, H//ratio]  sequeeze.weight^T       we: [H//ratio, H] excitation.weight^T
    Returns [B, H].
    """
    n = len(inputs)
    B = inputs[0].shape[0]
    dims = [x.shape[1] for x in inputs]
    M = sum(dims)
    H = wf.shape[1]
    R = ws.shape[1]

    # Lane-dense padding of the hidden / squeeze dims (unmasked stores, full
    # MXU N tiles). Zero padding does not change the real columns.
    LANE = 128
    H_pad = _round_up(H, LANE)
    R_pad = _round_up(R, LANE)
    if H_pad != H or R_pad != R:
        wf = jnp.pad(wf, ((0, 0), (0, H_pad - H)))
        bf = jnp.pad(bf, (0, H_pad - H))
        ws = jnp.pad(ws, ((0, H_pad - H), (0, R_pad - R)))
        we = jnp.pad(we, ((0, R_pad - R), (0, H_pad - H)))
    bf2 = bf.reshape(1, H_pad)

    # Split the (pre-transposed) fusion weight per input:
    # cat(inputs, dim=1) @ Wf == sum_i inputs_i @ Wf[rows_i].
    w_splits = []
    off = 0
    for d in dims:
        w_splits.append(wf[off:off + d, :])
        off += d

    out_dtype = inputs[0].dtype
    itemsize = jnp.dtype(out_dtype).itemsize
    TB = _pick_batch_tile(B, M, H_pad, itemsize)
    n_tiles = pl.cdiv(B, TB)

    x_specs = [pl.BlockSpec((TB, d), lambda i: (i, 0)) for d in dims]
    w_specs = [pl.BlockSpec((d, H_pad), lambda i: (0, 0)) for d in dims]
    fixed_specs = [
        pl.BlockSpec((1, H_pad), lambda i: (0, 0)),       # bias
        pl.BlockSpec((H_pad, R_pad), lambda i: (0, 0)),   # squeeze W^T
        pl.BlockSpec((R_pad, H_pad), lambda i: (0, 0)),   # excitation W^T
    ]
    out_spec = pl.BlockSpec((TB, H_pad), lambda i: (i, 0))

    flops = 2 * B * (M * H_pad + H_pad * R_pad + R_pad * H_pad) + 4 * B * H_pad
    bytes_accessed = itemsize * (
        B * M + M * H_pad + H_pad + H_pad * R_pad + R_pad * H_pad + B * H_pad)
    cost = pl.CostEstimate(flops=flops,
                           transcendentals=B * H_pad,
                           bytes_accessed=bytes_accessed)

    out_pad = pl.pallas_call(
        _make_kernel(n),
        out_shape=jax.ShapeDtypeStruct((B, H_pad), out_dtype),
        grid=(n_tiles,),
        in_specs=x_specs + w_specs + fixed_specs,
        out_specs=out_spec,
        compiler_params=pltpu.CompilerParams(
            dimension_semantics=("parallel",),
            vmem_limit_bytes=32 * 1024 * 1024),
        cost_estimate=cost,
    )(*inputs, *w_splits, bf2, ws, we)

    return out_pad[:, :H] if H_pad != H else out_pad


def _uniform(key, shape, bound):
    return jax.random.uniform(key, shape, jnp.float32, -bound, bound)


if __name__ == "__main__":
    # Small shapes consistent with the module:
    #   two modality inputs of dim 32 each -> multimodal_hidden_size = 64
    #   hidden_size = 32, se_ratio = 8 -> squeeze dim = 4
    B = 8
    D1, D2 = 32, 32
    M = D1 + D2          # multimodal_hidden_size
    H = 32               # hidden_size
    SE_RATIO = 8
    R = H // SE_RATIO

    key = jax.random.PRNGKey(0)
    k_x1, k_x2, k_wf, k_bf, k_ws, k_we = jax.random.split(key, 6)

    x1 = jax.random.normal(k_x1, (B, D1), jnp.float32)
    x2 = jax.random.normal(k_x2, (B, D2), jnp.float32)

    # nn.Linear-style deterministic init: U(-1/sqrt(fan_in), +1/sqrt(fan_in)).
    # Stored transposed ([in, out]) relative to PyTorch's [out, in].
    wf = _uniform(k_wf, (M, H), 1.0 / (M ** 0.5))   # fusion.weight^T
    bf = _uniform(k_bf, (H,), 1.0 / (M ** 0.5))     # fusion.bias
    ws = _uniform(k_ws, (H, R), 1.0 / (H ** 0.5))   # enhance.sequeeze.weight^T
    we = _uniform(k_we, (R, H), 1.0 / (R ** 0.5))   # enhance.excitation.weight^T

    out = concat_dense_se([x1, x2], wf, bf, ws, we)
    out = jax.block_until_ready(out)

    # Pure-JAX reference for sanity check.
    x = jnp.concatenate([x1, x2], axis=1)
    h_ref = x @ wf + bf
    g_ref = jax.nn.sigmoid(jnp.maximum(h_ref @ ws, 0.0) @ we)
    ref = h_ref * g_ref
    assert out.shape == (B, H)
    assert jnp.allclose(out, ref, atol=2e-5, rtol=2e-5)

    print("KERNEL_OK")
</pallas_src>

<mosaic_0001>
module attributes {stable_mosaic.version = 11 : i64} {
  func.func @kernel(%arg0: i32, %arg1: memref<8x32xf32, #tpu.memory_space<vmem>>, %arg2: memref<8x32xf32, #tpu.memory_space<vmem>>, %arg3: memref<32x128xf32, #tpu.memory_space<vmem>>, %arg4: memref<32x128xf32, #tpu.memory_space<vmem>>, %arg5: memref<1x128xf32, #tpu.memory_space<vmem>>, %arg6: memref<128x128xf32, #tpu.memory_space<vmem>>, %arg7: memref<128x128xf32, #tpu.memory_space<vmem>>, %arg8: memref<8x128xf32, #tpu.memory_space<vmem>>) attributes {dimension_semantics = [#tpu.dimension_semantics<parallel>], iteration_bounds = array<i64: 1>, scalar_prefetch = 0 : i64, scratch_operands = 0 : i64, tpu.core_type = #tpu.core_type<tc>, window_params = [{transform_indices = @transform_0, window_bounds = array<i64: 8, 32>}, {transform_indices = @transform_1, window_bounds = array<i64: 8, 32>}, {pipeline_mode = #tpu.pipeline_mode<synchronous>, transform_indices = @transform_2, window_bounds = array<i64: 32, 128>}, {pipeline_mode = #tpu.pipeline_mode<synchronous>, transform_indices = @transform_3, window_bounds = array<i64: 32, 128>}, {pipeline_mode = #tpu.pipeline_mode<synchronous>, transform_indices = @transform_4, window_bounds = array<i64: 1, 128>}, {pipeline_mode = #tpu.pipeline_mode<synchronous>, transform_indices = @transform_5, window_bounds = array<i64: 128, 128>}, {pipeline_mode = #tpu.pipeline_mode<synchronous>, transform_indices = @transform_6, window_bounds = array<i64: 128, 128>}, {transform_indices = @transform_7, window_bounds = array<i64: 8, 128>}]} {
    %c0 = arith.constant 0 : index
    %c0_0 = arith.constant 0 : index
    %0 = vector.load %arg1[%c0, %c0_0] : memref<8x32xf32, #tpu.memory_space<vmem>>, vector<8x32xf32>
    %c0_1 = arith.constant 0 : index
    %c0_2 = arith.constant 0 : index
    %1 = vector.load %arg3[%c0_1, %c0_2] : memref<32x128xf32, #tpu.memory_space<vmem>>, vector<32x128xf32>
    %cst = arith.constant dense<0.000000e+00> : vector<8x128xf32>
    %2 = tpu.matmul %0, %1, %cst {dimension_numbers = #tpu.dot_dimension_numbers<[1], [0], [0], [1], [0, 0, 1, 1], [], []>} : vector<8x32xf32>, vector<32x128xf32>, vector<8x128xf32> -> vector<8x128xf32>
    %c0_3 = arith.constant 0 : index
    %c0_4 = arith.constant 0 : index
    %3 = vector.load %arg2[%c0_3, %c0_4] : memref<8x32xf32, #tpu.memory_space<vmem>>, vector<8x32xf32>
    %c0_5 = arith.constant 0 : index
    %c0_6 = arith.constant 0 : index
    %4 = vector.load %arg4[%c0_5, %c0_6] : memref<32x128xf32, #tpu.memory_space<vmem>>, vector<32x128xf32>
    %cst_7 = arith.constant dense<0.000000e+00> : vector<8x128xf32>
    %5 = tpu.matmul %3, %4, %cst_7 {dimension_numbers = #tpu.dot_dimension_numbers<[1], [0], [0], [1], [0, 0, 1, 1], [], []>} : vector<8x32xf32>, vector<32x128xf32>, vector<8x128xf32> -> vector<8x128xf32>
    %6 = arith.addf %2, %5 : vector<8x128xf32>
    %c0_8 = arith.constant 0 : index
    %c0_9 = arith.constant 0 : index
    %7 = vector.load %arg5[%c0_8, %c0_9] : memref<1x128xf32, #tpu.memory_space<vmem>>, vector<1x128xf32>
    %8 = vector.broadcast %7 : vector<1x128xf32> to vector<8x128xf32>
    %9 = arith.addf %6, %8 : vector<8x128xf32>
    %c0_10 = arith.constant 0 : index
    %c0_11 = arith.constant 0 : index
    %10 = vector.load %arg6[%c0_10, %c0_11] : memref<128x128xf32, #tpu.memory_space<vmem>>, vector<128x128xf32>
    %cst_12 = arith.constant dense<0.000000e+00> : vector<8x128xf32>
    %11 = tpu.matmul %9, %10, %cst_12 {dimension_numbers = #tpu.dot_dimension_numbers<[1], [0], [0], [1], [0, 0, 1, 1], [], []>} : vector<8x128xf32>, vector<128x128xf32>, vector<8x128xf32> -> vector<8x128xf32>
    %cst_13 = arith.constant 0.000000e+00 : f32
    %12 = vector.broadcast %cst_13 : f32 to vector<8x128xf32>
    %13 = arith.maximumf %11, %12 : vector<8x128xf32>
    %c0_14 = arith.constant 0 : index
    %c0_15 = arith.constant 0 : index
    %14 = vector.load %arg7[%c0_14, %c0_15] : memref<128x128xf32, #tpu.memory_space<vmem>>, vector<128x128xf32>
    %cst_16 = arith.constant dense<0.000000e+00> : vector<8x128xf32>
    %15 = tpu.matmul %13, %14, %cst_16 {dimension_numbers = #tpu.dot_dimension_numbers<[1], [0], [0], [1], [0, 0, 1, 1], [], []>} : vector<8x128xf32>, vector<128x128xf32>, vector<8x128xf32> -> vector<8x128xf32>
    %16 = arith.negf %15 : vector<8x128xf32>
    %17 = math.exp %16 : vector<8x128xf32>
    %cst_17 = arith.constant 1.000000e+00 : f32
    %18 = vector.broadcast %cst_17 : f32 to vector<8x128xf32>
    %19 = arith.addf %18, %17 : vector<8x128xf32>
    %20 = arith.divf %18, %19 : vector<8x128xf32>
    %21 = arith.mulf %9, %20 : vector<8x128xf32>
    %c0_18 = arith.constant 0 : index
    %c0_19 = arith.constant 0 : index
    %22 = vector.load %arg8[%c0_18, %c0_19] : memref<8x128xf32, #tpu.memory_space<vmem>>, vector<8x128xf32>
    tpu.vector_store %arg8[%c0_18, %c0_19], %21 {strides = array<i32>} : memref<8x128xf32, #tpu.memory_space<vmem>>, vector<8x128xf32>,
    return
  }
  func.func @transform_0(%arg0: i32) -> (i32, i32) {
    %c0_i32 = arith.constant 0 : i32
    %c0_i32_0 = arith.constant 0 : i32
    return %arg0, %c0_i32 : i32, i32
  }
  func.func @transform_1(%arg0: i32) -> (i32, i32) {
    %c0_i32 = arith.constant 0 : i32
    %c0_i32_0 = arith.constant 0 : i32
    return %arg0, %c0_i32 : i32, i32
  }
  func.func @transform_2(%arg0: i32) -> (i32, i32) {
    %c0_i32 = arith.constant 0 : i32
    %c0_i32_0 = arith.constant 0 : i32
    %c0_i32_1 = arith.constant 0 : i32
    return %c0_i32, %c0_i32_0 : i32, i32
  }
  func.func @transform_3(%arg0: i32) -> (i32, i32) {
    %c0_i32 = arith.constant 0 : i32
    %c0_i32_0 = arith.constant 0 : i32
    %c0_i32_1 = arith.constant 0 : i32
    return %c0_i32, %c0_i32_0 : i32, i32
  }
  func.func @transform_4(%arg0: i32) -> (i32, i32) {
    %c0_i32 = arith.constant 0 : i32
    %c0_i32_0 = arith.constant 0 : i32
    %c0_i32_1 = arith.constant 0 : i32
    return %c0_i32, %c0_i32_0 : i32, i32
  }
  func.func @transform_5(%arg0: i32) -> (i32, i32) {
    %c0_i32 = arith.constant 0 : i32
    %c0_i32_0 = arith.constant 0 : i32
    %c0_i32_1 = arith.constant 0 : i32
    return %c0_i32, %c0_i32_0 : i32, i32
  }
  func.func @transform_6(%arg0: i32) -> (i32, i32) {
    %c0_i32 = arith.constant 0 : i32
    %c0_i32_0 = arith.constant 0 : i32
    %c0_i32_1 = arith.constant 0 : i32
    return %c0_i32, %c0_i32_0 : i32, i32
  }
  func.func @transform_7(%arg0: i32) -> (i32, i32) {
    %c0_i32 = arith.constant 0 : i32
    %c0_i32_0 = arith.constant 0 : i32
    return %arg0, %c0_i32 : i32, i32
  }
}

</mosaic_0001>

<bundles_post_ra>
// kernel: tpu_custom_call.1
= control target key start
LH: loop header
LB: loop body
LE: loop exit
PB: predicated region body
PF: predicated region fallthrough
CT: control target
= control target key end

     0   :  { %12 = vsyncpa [#allocation3], 0  ;;  %s1024_s0 = inlined_call_operand.hbm [shape: f32[8,32], index: 0, kind: input, shape index: {}]   ;;  %s1025_s1 = inlined_call_operand.hbm [shape: f32[8,32], index: 1, kind: input, shape index: {}]   ;;  %s1026_s2 = inlined_call_operand.hbm [shape: f32[32,128], index: 2, kind: input, shape index: {}]   ;;  %s1027_s3 = inlined_call_operand.hbm [shape: f32[32,128], index: 3, kind: input, shape index: {}]   ;;  %s1028_s4 = inlined_call_operand.vmem [shape: f32[1,128], index: 4, kind: input, shape index: {}]   ;;  %s1029_s5 = inlined_call_operand.hbm [shape: f32[128,128], index: 5, kind: input, shape index: {}]   ;;  %s1030_s6 = inlined_call_operand.hbm [shape: f32[128,128], index: 6, kind: input, shape index: {}]   ;;  %s1031_s7 = inlined_call_operand.hbm [shape: f32[8,128], index: 7, kind: output, shape index: {}]  }
   0x1   :  { %13 = vsyncpa [#allocation6], 0 }
   0x2   :  { %14 = vsyncpa [#allocation9], 0 }
   0x3   :  { %15 = vsyncpa [#allocation12], 0 }
   0x4   :  { %16 = vsyncpa [#allocation4], 0  ;;  %s849_s24 = smov [#allocation5]   ;;  %s685_s28 = scalar_lea.hbm %s1025_s1, 128 }
   0x5   :  { %s33_s25 = sshll.u32 %s849_s24, 4  ;;  %p686_p0 = scmp.ne.s32.totalorder %s1025_s1, %s685_s28  ;;  %s34_s25 = int_to_ptr.vmem [resolvable:$true] %s33_s25 }
   0x6   :  { %p689_p1 = scmp.lt.u32.totalorder %s685_s28, %s1025_s1 }
   0x8   :  { %p691_p2 = pnand %p689_p1, %p686_p0 }
   0xa   :  { %694 = shalt.err (!%p691_p2)
}
   0xb   :  { %s695_s10 = scalar_lea.vmem %s34_s25, 128  ;;  %p700_p4 = scmp.lt.s32.totalorder %s34_s25, %s34_s25 }
   0xc   :  { %p696_p3 = scmp.ne.s32.totalorder %s34_s25, %s695_s10  ;;  %p701_p5 = scmp.lt.s32.totalorder %s695_s10, %s695_s10 }
   0xe   :  { %p702_p6 = por %p701_p5, %p700_p4 }
  0x10   :  { %p703_p7 = pnand %p702_p6, %p696_p3 }
  0x12   :  { %706 = shalt.err (!%p703_p7)
}
  0x13   :  { %36 = dma.hbm_to_vmem [thread:$0]  %s1025_s1, 128, %s34_s25, [#allocation6]  }
  0x14   :  { %s850_s13 = smov [#allocation8]   ;;  %s851_s15 = smov [#allocation2]  }
  0x15   :  { %s54_s14 = sshll.u32 %s850_s13, 4  ;;  %s23_s16 = sshll.u32 %s851_s15, 4  ;;  %s55_s14 = int_to_ptr.vmem [resolvable:$true] %s54_s14  ;;  %s24_s16 = int_to_ptr.vmem [resolvable:$true] %s23_s16 }
  0x16   :  { %s707_s19 = scalar_lea.hbm %s1027_s3, 512 }
  0x17   :  { %p708_p8 = scmp.ne.s32.totalorder %s1027_s3, %s707_s19  ;;  %p711_p9 = scmp.lt.u32.totalorder %s707_s19, %s1027_s3 }
  0x19   :  { %p713_p10 = pnand %p711_p9, %p708_p8 }
  0x1b   :  { %716 = shalt.err (!%p713_p10)
}
  0x1c   :  { %s717_s1 = scalar_lea.vmem %s55_s14, 512  ;;  %p722_p12 = scmp.lt.s32.totalorder %s55_s14, %s55_s14 }
  0x1d   :  { %p718_p11 = scmp.ne.s32.totalorder %s55_s14, %s717_s1  ;;  %p723_p13 = scmp.lt.s32.totalorder %s717_s1, %s717_s1 }
  0x1f   :  { %p724_p0 = por %p723_p13, %p722_p12 }
  0x21   :  { %p725_p1 = pnand %p724_p0, %p718_p11 }
  0x23   :  { %728 = shalt.err (!%p725_p1)
}
  0x24   :  { %s852_s24 = smov 128   ;;  %s853_s25 = smov 8  }
  0x25   :  { %60 = dma.hbm_to_vmem [thread:$0]  %s1027_s3, 512, %s55_s14, [#allocation9], %s852_s24, %s852_s24, %s853_s25  }
  0x26   :  { %s729_s30 = scalar_lea.hbm %s1024_s0, 128 }
  0x27   :  { %p730_p2 = scmp.ne.s32.totalorder %s1024_s0, %s729_s30  ;;  %p733_p3 = scmp.lt.u32.totalorder %s729_s30, %s1024_s0 }
  0x29   :  { %p735_p4 = pnand %p733_p3, %p730_p2 }
  0x2b   :  { %738 = shalt.err (!%p735_p4)
}
  0x2c   :  { %s739_s12 = scalar_lea.vmem %s24_s16, 128  ;;  %p744_p6 = scmp.lt.s32.totalorder %s24_s16, %s24_s16 }
  0x2d   :  { %p740_p5 = scmp.ne.s32.totalorder %s24_s16, %s739_s12  ;;  %p745_p7 = scmp.lt.s32.totalorder %s739_s12, %s739_s12 }
  0x2f   :  { %p746_p8 = por %p745_p7, %p744_p6 }
  0x31   :  { %p747_p9 = pnand %p746_p8, %p740_p5 }
  0x33   :  { %750 = shalt.err (!%p747_p9)
}
  0x34   :  { %26 = dma.hbm_to_vmem [thread:$0]  %s1024_s0, 128, %s24_s16, [#allocation3]  }
  0x35   :  { %s854_s14 = smov [#allocation7]   ;;  %s855_s17 = smov [#allocation10]  }
  0x36   :  { %s42_s15 = sshll.u32 %s854_s14, 4  ;;  %s68_s18 = sshll.u32 %s855_s17, 4  ;;  %s43_s15 = int_to_ptr.vmem [resolvable:$true] %s42_s15  ;;  %s69_s18 = int_to_ptr.vmem [resolvable:$true] %s68_s18 }
  0x37   :  { %s751_s21 = scalar_lea.hbm %s1026_s2, 512 }
  0x38   :  { %p752_p10 = scmp.ne.s32.totalorder %s1026_s2, %s751_s21  ;;  %p755_p11 = scmp.lt.u32.totalorder %s751_s21, %s1026_s2 }
  0x3a   :  { %p757_p12 = pnand %p755_p11, %p752_p10 }
  0x3c   :  { %760 = shalt.err (!%p757_p12)
}
  0x3d   :  { %s761_s0 = scalar_lea.vmem %s43_s15, 512  ;;  %p766_p0 = scmp.lt.s32.totalorder %s43_s15, %s43_s15 }
  0x3e   :  { %p762_p13 = scmp.ne.s32.totalorder %s43_s15, %s761_s0  ;;  %p767_p1 = scmp.lt.s32.totalorder %s761_s0, %s761_s0 }
  0x40   :  { %p768_p2 = por %p767_p1, %p766_p0 }
  0x42   :  { %p769_p3 = pnand %p768_p2, %p762_p13 }
  0x44   :  { %772 = shalt.err (!%p769_p3)
}
  0x45   :  { %48 = dma.hbm_to_vmem [thread:$0]  %s1026_s2, 512, %s43_s15, [#allocation6], %s852_s24, %s852_s24, %s853_s25  }
  0x46   :  { %s773_s30 = scalar_lea.hbm %s1029_s5, 2048 }
  0x47   :  { %p774_p4 = scmp.ne.s32.totalorder %s1029_s5, %s773_s30  ;;  %p777_p5 = scmp.lt.u32.totalorder %s773_s30, %s1029_s5 }
  0x49   :  { %p779_p6 = pnand %p777_p5, %p774_p4 }
  0x4b   :  { %782 = shalt.err (!%p779_p6)
}
  0x4c   :  { %s783_s12 = scalar_lea.vmem %s69_s18, 2048  ;;  %p788_p8 = scmp.lt.s32.totalorder %s69_s18, %s69_s18 }
  0x4d   :  { %p784_p7 = scmp.ne.s32.totalorder %s69_s18, %s783_s12  ;;  %p789_p9 = scmp.lt.s32.totalorder %s783_s12, %s783_s12 }
  0x4f   :  { %p790_p10 = por %p789_p9, %p788_p8 }
  0x51   :  { %p791_p11 = pnand %p790_p10, %p784_p7 }
  0x53   :  { %794 = shalt.err (!%p791_p11)
}
  0x54   :  { %74 = dma.hbm_to_vmem [thread:$0]  %s1029_s5, 2048, %s69_s18, [#allocation9], %s852_s24, %s852_s24, %s853_s25  }
  0x55   :  { %s856_s13 = smov [#allocation11]   ;;  %s795_s19 = scalar_lea.hbm %s1030_s6, 2048 }
  0x56   :  { %s80_s14 = sshll.u32 %s856_s13, 4  ;;  %p796_p12 = scmp.ne.s32.totalorder %s1030_s6, %s795_s19  ;;  %s81_s14 = int_to_ptr.vmem [resolvable:$true] %s80_s14 }
  0x57   :  { %p799_p13 = scmp.lt.u32.totalorder %s795_s19, %s1030_s6 }
  0x59   :  { %p801_p0 = pnand %p799_p13, %p796_p12 }
  0x5b   :  { %804 = shalt.err (!%p801_p0)
}
  0x5c   :  { %s805_s1 = scalar_lea.vmem %s81_s14, 2048  ;;  %p810_p2 = scmp.lt.s32.totalorder %s81_s14, %s81_s14 }
  0x5d   :  { %p806_p1 = scmp.ne.s32.totalorder %s81_s14, %s805_s1  ;;  %p811_p3 = scmp.lt.s32.totalorder %s805_s1, %s805_s1 }
  0x5f   :  { %p812_p4 = por %p811_p3, %p810_p2 }
  0x61   :  { %p813_p5 = pnand %p812_p4, %p806_p1 }
  0x63   :  { %816 = shalt.err (!%p813_p5)
}
  0x64   :  { %86 = dma.hbm_to_vmem [thread:$0]  %s1030_s6, 2048, %s81_s14, [#allocation12], %s852_s24, %s852_s24, %s853_s25  }
  0x65   :  { %839 = dma.done.wait [#allocation3], 128  }
  0x66   :  { %840 = vsyncadd [#allocation3], 4294967168 }
  0x67   :  { %841 = dma.done.wait [#allocation6], 640  }
  0x68   :  { %842 = vsyncadd [#allocation6], 4294966656 }
  0x69   :  { %843 = dma.done.wait [#allocation9], 2560  }
  0x6a   :  { %844 = vsyncadd [#allocation9], 4294964736 }
  0x6b   :  { %845 = dma.done.wait [#allocation12], 2048  }
  0x6c   :  { %846 = vsyncadd [#allocation12], 4294965248  ;;  %v857_v0 = vmov 0.0|0.0   ;;  %vm858_vm0 = vmmov 0   ;;  %v859_v1 = vmov 0.0   ;;  %v111_v2 = vld [vmem:[#allocation8] sm:$0xff] }
  0x6d   :  { %609 = vmatprep.subr.bf16.mxu0 %v857_v0  ;;  %615 = vmatprep.subr.bf16.mxu1 %v857_v0  ;;  %v112_v3 = vld [vmem:[#allocation8 + $0x8] sm:$0xff]  ;;  %v106_v4 = vld [vmem:[#allocation7] sm:$0xff]  ;;  %v113_v7 = vld [vmem:[#allocation8 + $0x10] sm:$0xff]  ;;  %vm115_vm1 = vcmask 261120  }
  0x6e   :  { %525 = vmatprep.mubr.msk.f32.mxu0 %vm858_vm0, %v859_v1  ;;  %536 = vmatprep.mubr.msk.f32.mxu1 %vm858_vm0, %v859_v1  ;;  %v610_v5 = vpack.c.bf16 %v112_v3, %v111_v2  ;;  %v107_v6 = vld [vmem:[#allocation7 + $0x8] sm:$0xff]  ;;  %v114_v8 = vld [vmem:[#allocation8 + $0x18] sm:$0xff]  ;;  %v108_v10 = vld [vmem:[#allocation7 + $0x10] sm:$0xff] }
  0x6f   :  { %v616_v9 = vpack.c.bf16 %v107_v6, %v106_v4  ;;  %v109_v11 = vld [vmem:[#allocation7 + $0x18] sm:$0xff]  ;;  %v613_v12 = vpack.c.bf16 %v114_v8, %v113_v7  ;;  %v270_v14 = vld [vmem:[#allocation10] sm:$0xff]  ;;  %v271_v15 = vld [vmem:[#allocation10 + $0x8] sm:$0xff] }
  0x70   :  { %611 = vmatpush3.bf16.msra.mxu0 %v610_v5  ;;  %v619_v13 = vpack.c.bf16 %v109_v11, %v108_v10  ;;  %v110_v16 = vld [vmem:[#allocation5] sm:$0xff]  ;;  %v622_v17 = vpack.c.bf16 %v271_v15, %v270_v14  ;;  %v105_v18 = vld [vmem:[#allocation2] sm:$0xff]  ;;  %v274_v22 = vld [vmem:[#allocation10 + $0x20] sm:$0xff] }
  0x71   :  { %617 = vmatpush3.bf16.msra.mxu1 %v616_v9  ;;  %612 = vmatprep.subr.bf16.mxu0 %v857_v0  ;;  %v272_v19 = vld [vmem:[#allocation10 + $0x10] sm:$0xff]  ;;  %v273_v20 = vld [vmem:[#allocation10 + $0x18] sm:$0xff]  ;;  %v275_v23 = vld [vmem:[#allocation10 + $0x28] sm:$0xff] }
  0x72   :  { %618 = vmatprep.subr.bf16.mxu1 %v857_v0  ;;  %v625_v21 = vpack.c.bf16 %v273_v20, %v272_v19  ;;  %v628_v24 = vpack.c.bf16 %v275_v23, %v274_v22  ;;  %v276_v25 = vld [vmem:[#allocation10 + $0x30] sm:$0xff]  ;;  %v277_v26 = vld [vmem:[#allocation10 + $0x38] sm:$0xff]  ;;  %v278_v28 = vld [vmem:[#allocation10 + $0x40] sm:$0xff] }
  0x73   :  { %v631_v27 = vpack.c.bf16 %v277_v26, %v276_v25  ;;  %v279_v29 = vld [vmem:[#allocation10 + $0x48] sm:$0xff]  ;;  %v280_v31 = vld [vmem:[#allocation10 + $0x50] sm:$0xff]  ;;  %v281_v32 = vld [vmem:[#allocation10 + $0x58] sm:$0xff] }
  0x74   :  { %614 = vmatpush3.bf16.msra.mxu0 %v613_v12  ;;  %v634_v30 = vpack.c.bf16 %v279_v29, %v278_v28  ;;  %v637_v33 = vpack.c.bf16 %v281_v32, %v280_v31  ;;  %v282_v34 = vld [vmem:[#allocation10 + $0x60] sm:$0xff]  ;;  %v283_v35 = vld [vmem:[#allocation10 + $0x68] sm:$0xff]  ;;  %v284_v37 = vld [vmem:[#allocation10 + $0x70] sm:$0xff] }
  0x75   :  { %620 = vmatpush3.bf16.msra.mxu1 %v619_v13  ;;  %621 = vmatprep.subr.bf16.mxu0 %v857_v0  ;;  %v640_v36 = vpack.c.bf16 %v283_v35, %v282_v34  ;;  %v285_v38 = vld [vmem:[#allocation10 + $0x78] sm:$0xff]  ;;  %v357_v40 = vld [vmem:[#allocation11] sm:$0xff]  ;;  %v358_v41 = vld [vmem:[#allocation11 + $0x8] sm:$0xff] }
  0x76   :  { %645 = vmatprep.subr.bf16.mxu1 %v857_v0  ;;  %v643_v39 = vpack.c.bf16 %v285_v38, %v284_v37  ;;  %v359_v42 = vld [vmem:[#allocation11 + $0x10] sm:$0xff]  ;;  %v646_v43 = vpack.c.bf16 %v358_v41, %v357_v40  ;;  %v360_v44 = vld [vmem:[#allocation11 + $0x18] sm:$0xff]  ;;  %v361_v46 = vld [vmem:[#allocation11 + $0x20] sm:$0xff] }
  0x77   :  { %526 = vmatmul.mubr.msk.f32.vlgmr.msra.gmra.mrb[0].mxu0 %vm115_vm1, %v110_v16  ;;  %v649_v45 = vpack.c.bf16 %v360_v44, %v359_v42  ;;  %v362_v47 = vld [vmem:[#allocation11 + $0x28] sm:$0xff]  ;;  %v363_v49 = vld [vmem:[#allocation11 + $0x30] sm:$0xff]  ;;  %v364_v50 = vld [vmem:[#allocation11 + $0x38] sm:$0xff] }
  0x78   :  { %537 = vmatmul.mubr.msk.f32.vlgmr.msra.gmra.mrb[0].mxu1 %vm115_vm1, %v105_v18  ;;  %623 = vmatpush3.bf16.msra.mxu0 %v622_v17  ;;  %v652_v48 = vpack.c.bf16 %v362_v47, %v361_v46  ;;  %v655_v51 = vpack.c.bf16 %v364_v50, %v363_v49  ;;  %v365_v52 = vld [vmem:[#allocation11 + $0x40] sm:$0xff]  ;;  %v366_v53 = vld [vmem:[#allocation11 + $0x48] sm:$0xff]  ;;  %v367_v55 = vld [vmem:[#allocation11 + $0x50] sm:$0xff] }
  0x79   :  { %624 = vmatprep.subr.bf16.mxu0 %v857_v0  ;;  %571 = vmatprep.mubr.msk.f32.mxu0 %vm858_vm0, %v859_v1  ;;  %v658_v54 = vpack.c.bf16 %v366_v53, %v365_v52  ;;  %v368_v56 = vld [vmem:[#allocation11 + $0x58] sm:$0xff]  ;;  %v369_v58 = vld [vmem:[#allocation11 + $0x60] sm:$0xff]  ;;  %v370_v59 = vld [vmem:[#allocation11 + $0x68] sm:$0xff] }
  0x7a   :  { %606 = vmatprep.mubr.msk.f32.mxu1 %vm858_vm0, %v859_v1  ;;  %647 = vmatpush3.bf16.msra.mxu1 %v646_v43  ;;  %v661_v57 = vpack.c.bf16 %v368_v56, %v367_v55  ;;  %v664_v60 = vpack.c.bf16 %v370_v59, %v369_v58  ;;  %v471_v63 = vld [vmem:[%s1028_s4] ss:$0 sm:$0xff]  ;;  %v372_v6 = vld [vmem:[#allocation11 + $0x78] sm:$0xff]  ;;  %s860_s4 = smov [#allocation13]  }
  0x7b   :  { %648 = vmatprep.subr.bf16.mxu1 %v857_v0  ;;  %v371_v5 = vld [vmem:[#allocation11 + $0x70] sm:$0xff]  ;;  %s457_s25 = sshll.u32 %s860_s4, 4  ;;  %s458_s25 = int_to_ptr.vmem [resolvable:$true] %s457_s25 }
  0x7c   :  { %626 = vmatpush3.bf16.msra.mxu0 %v625_v21  ;;  %v667_v7 = vpack.c.bf16 %v372_v6, %v371_v5  ;;  %s817_s26 = scalar_lea.vmem %s458_s25, 128  ;;  %p822_p7 = scmp.lt.s32.totalorder %s458_s25, %s458_s25 }
  0x7d   :  { %627 = vmatprep.subr.bf16.mxu0 %v857_v0  ;;  %p818_p6 = scmp.ne.s32.totalorder %s458_s25, %s817_s26  ;;  %p823_p8 = scmp.lt.s32.totalorder %s817_s26, %s817_s26 }
  0x7e   :  { %650 = vmatpush3.bf16.msra.mxu1 %v649_v45 }
  0x7f   :  { %651 = vmatprep.subr.bf16.mxu1 %v857_v0  ;;  %p824_p9 = por %p823_p8, %p822_p7 }
  0x80   :  { %629 = vmatpush3.bf16.msra.mxu0 %v628_v24 }
  0x81   :  { %630 = vmatprep.subr.bf16.mxu0 %v857_v0  ;;  %p825_p10 = pnand %p824_p9, %p818_p6 }
  0x82   :  { %653 = vmatpush3.bf16.msra.mxu1 %v652_v48 }
  0x83   :  { %654 = vmatprep.subr.bf16.mxu1 %v857_v0 }
  0x84   :  { %632 = vmatpush3.bf16.msra.mxu0 %v631_v27 }
  0x85   :  { %633 = vmatprep.subr.bf16.mxu0 %v857_v0 }
  0x86   :  { %656 = vmatpush3.bf16.msra.mxu1 %v655_v51 }
  0x87   :  { %657 = vmatprep.subr.bf16.mxu1 %v857_v0 }
  0x88   :  { %635 = vmatpush3.bf16.msra.mxu0 %v634_v30 }
  0x89   :  { %636 = vmatprep.subr.bf16.mxu0 %v857_v0 }
  0x8a   :  { %659 = vmatpush3.bf16.msra.mxu1 %v658_v54 }
  0x8b   :  { %660 = vmatprep.subr.bf16.mxu1 %v857_v0 }
  0x8c   :  { %638 = vmatpush3.bf16.msra.mxu0 %v637_v33 }
  0x8d   :  { %639 = vmatprep.subr.bf16.mxu0 %v857_v0 }
  0x8e   :  { %662 = vmatpush3.bf16.msra.mxu1 %v661_v57 }
  0x8f   :  { %663 = vmatprep.subr.bf16.mxu1 %v857_v0 }
  0x90   :  { %641 = vmatpush3.bf16.msra.mxu0 %v640_v36 }
  0x91   :  { %642 = vmatprep.subr.bf16.mxu0 %v857_v0 }
  0x92   :  { %665 = vmatpush3.bf16.msra.mxu1 %v664_v60 }
  0x93   :  { %666 = vmatprep.subr.bf16.mxu1 %v857_v0 }
  0x94   :  { %644 = vmatpush3.bf16.msra.mxu0 %v643_v39 }
  0x96   :  { %668 = vmatpush3.bf16.msra.mxu1 %v667_v7 }
 0x14a   :  { %v185_v61 = vpop.f32.mrb[0].mxu0 }
 0x14b   :  { %v258_v62 = vpop.f32.mrb[0].mxu1  ;;  %v527_v1 = vpop.f32.mrb[1].mxu0 }
 0x14c   :  { %v259_v2 = vadd.f32 %v258_v62, %v185_v61  ;;  %v538_v3 = vpop.f32.mrb[1].mxu1 }
 0x14e   :  { %v269_v4 = vadd.f32 %v471_v63, %v259_v2 }
 0x150   :  { %572 = vmatmul.mubr.f32.vlgmr.msra.gmra.mrb[2].mxu0 %v269_v4 }
 0x223   :  { %v352_v8 = vpop.f32.mrb[2].mxu0 }
 0x224   :  { %v356_v9 = vmax.f32 %v352_v8, 0.0  ;;  %v573_v10 = vpop.f32.mrb[3].mxu0 }
 0x226   :  { %607 = vmatmul.mubr.f32.vlgmr.msra.gmra.mrb[2].mxu1 %v356_v9 }
 0x2f9   :  { %v439_v0 = vpop.f32.mrb[2].mxu1 }
 0x2fa   :  { %v472_v11 = vmul.f32 -1.442695, %v439_v0  ;;  %v608_v12 = vpop.f32.mrb[3].mxu1 }
 0x2fc   :  { %681 = vpow2.f32 %v472_v11 }
 0x306   :  { %v682_v13 = vpop.eup %681 }
 0x307   :  { %v446_v14 = vadd.f32 1.0, %v682_v13 }
 0x309   :  { %683 = vrcp.f32 %v446_v14 }
 0x313   :  { %v684_v15 = vpop.eup %683 }
 0x314   :  { %v449_v16 = vmul.f32 %v684_v15, %v269_v4 }
 0x316   :  { %450 = vst [vmem:[#allocation13] sm:$0xff] %v449_v16 }
 0x317   :  { %828 = shalt.err (!%p825_p10)
}
 0x318   :  { %s829_s27 = scalar_lea.hbm %s1031_s7, 128 }
 0x319   :  { %p830_p11 = scmp.ne.s32.totalorder %s1031_s7, %s829_s27  ;;  %p833_p12 = scmp.lt.u32.totalorder %s829_s27, %s1031_s7 }
 0x31b   :  { %p835_p13 = pnand %p833_p12, %p830_p11 }
 0x31d   :  { %838 = shalt.err (!%p835_p13)
}
 0x31e   :  { %460 = dma.vmem_to_hbm [thread:$0]  %s458_s25, 128, %s1031_s7, [#allocation4]  }
 0x31f   :  { %847 = dma.done.wait [#allocation4], 128  }
 0x320   :  { %848 = vsyncadd [#allocation4], 4294967168 }
 0x321   :  { %464 = vsyncpa [#allocation3], 1 }
 0x322   :  { %465 = vsyncpa [#allocation6], 1 }
 0x323   :  { %466 = vsyncpa [#allocation9], 1 }
 0x324   :  { %467 = vsyncpa [#allocation12], 1 }
 0x325   :  { %468 = vsyncpa [#allocation4], 1 }

</bundles_post_ra>
